<compile_context>
chip_gen: v7x
topology: tpu7x:2x2x1
jax: 0.10.0
libtpu: 0.0.40
codegen_flags: <defaults>
</compile_context>

<pallas_src>
import jax
import jax.numpy as jnp
from jax.experimental import pallas as pl
from jax.experimental.pallas import tpu as pltpu

NEG_SLOPE = 0.2  # LeakyReLU negative_slope used in the PyTorch module


def _leaky_relu(x):
    # Valid for 0 <= slope < 1: max(x, slope*x) == leaky_relu(x).
    return jnp.maximum(x, NEG_SLOPE * x)


def twinned_q_kernel(z_ref, a_ref, w1z_ref, w1a_ref, b1_ref,
                     w2_ref, b2_ref, w3_ref, b3_ref, o_ref):
    # z_ref:   (bb, Z)   bf16      a_ref:   (bb, A)   f32
    # w1z_ref: (Z, 2*H1) bf16      w1a_ref: (A, 2*H1) f32     b1_ref: (1, 2*H1) f32
    # w2_ref:  (2*H1, 2*H2) bf16   b2_ref:  (1, 2*H2) f32
    # w3_ref:  (2*H2, 2) bf16      b3_ref:  (1, 2)    f32
    # o_ref:   (bb, 2) f32 -- column 0 = q1, column 1 = q2

    # ---- layer 1: MXU for the z part (bf16 x bf16 -> f32 accumulate),
    #      unrolled VPU multiply-adds for the tiny (K = action_dim) action part.
    acc = jnp.dot(z_ref[...], w1z_ref[...], preferred_element_type=jnp.float32)
    acc = acc + b1_ref[...]
    a = a_ref[...]            # (bb, A) f32
    w1a = w1a_ref[...]        # (A, 2*H1) f32
    for k in range(a.shape[1]):          # static unroll; A is the action dim (~4)
        acc = acc + a[:, k:k + 1] * w1a[k:k + 1, :]
    h = _leaky_relu(acc)                                              # (bb, 2*H1) f32

    # ---- layer 2 (block-diagonal weights keep the twins independent)
    h = jnp.dot(h.astype(jnp.bfloat16), w2_ref[...],
                preferred_element_type=jnp.float32) + b2_ref[...]
    h = _leaky_relu(h)                                                # (bb, 2*H2) f32

    # ---- output layer (lane-packed: one column per twin net)
    q = jnp.dot(h.astype(jnp.bfloat16), w3_ref[...],
                preferred_element_type=jnp.float32) + b3_ref[...]
    o_ref[...] = q                                                    # (bb, 2) f32


def pack_params(params, z_dim):
    """Pack per-net params (net axis = 2) into the fused lane-packed layout.

    Matmul weights are stored in bf16 (MXU-native single pass); biases and the
    VPU-path action weights stay f32.  The zero blocks of the block-diagonal
    W2/W3 are exact zeros, preserving twin-net independence exactly.
    """
    w1, b1, w2, b2, w3, b3 = params
    H1 = w1.shape[-1]
    H2 = w2.shape[-1]

    # W1: rows [0:z_dim] multiply z, rows [z_dim:] multiply action
    # (the PyTorch module concatenates [z, action]).
    w1z = jnp.concatenate([w1[0, :z_dim, :], w1[1, :z_dim, :]], axis=1)  # (Z, 2*H1)
    w1a = jnp.concatenate([w1[0, z_dim:, :], w1[1, z_dim:, :]], axis=1)  # (A, 2*H1)
    b1p = jnp.concatenate([b1[0], b1[1]], axis=0)[None, :]               # (1, 2*H1)

    zero_hh = jnp.zeros((H1, H2), jnp.float32)
    w2p = jnp.block([[w2[0], zero_hh], [zero_hh, w2[1]]])                # (2*H1, 2*H2)
    b2p = jnp.concatenate([b2[0], b2[1]], axis=0)[None, :]               # (1, 2*H2)

    zero_col = jnp.zeros((H2, 1), jnp.float32)
    w3p = jnp.block([[w3[0], zero_col], [zero_col, w3[1]]])              # (2*H2, 2)
    b3p = jnp.concatenate([b3[0], b3[1]], axis=0)[None, :]               # (1, 2)

    return (w1z.astype(jnp.bfloat16),        # MXU operand
            w1a.astype(jnp.float32),         # VPU operand (f32: safe on v5e too)
            b1p.astype(jnp.float32),
            w2p.astype(jnp.bfloat16),        # MXU operand
            b2p.astype(jnp.float32),
            w3p.astype(jnp.bfloat16),        # MXU operand
            b3p.astype(jnp.float32))


def _choose_batch_tile(B, block_b):
    """Pick a batch tile: multiple of 8, >=2 grid steps when B > 1024 (v7x)."""
    block_b = max(8, (block_b // 8) * 8)
    if B <= block_b:
        if B <= 1024:
            return B                         # single step; full-dim block is legal
        # Force >= 2 grid steps so the "parallel" axis shards over v7x's 2 TCs.
        half = -(-B // 2)                    # cdiv(B, 2)
        return min(block_b, -(-half // 8) * 8)
    return block_b


def twinned_q_packed(z, action, packed, *, block_b=4096):
    """Fused twin-Q forward. Returns (B, 2): column 0 = q1, column 1 = q2."""
    z = z.astype(jnp.bfloat16)               # MXU operand
    action = action.astype(jnp.float32)      # VPU operand
    B, Zdim = z.shape
    A = action.shape[1]
    w1z, w1a, b1p, w2p, b2p, w3p, b3p = packed
    H1p = w1z.shape[1]   # 2*H1
    H2p = w2p.shape[1]   # 2*H2

    # Sweepable; on v5e keep block_b <= ~4096 or raise vmem_limit_bytes further.
    bb = _choose_batch_tile(B, block_b)
    grid = (pl.cdiv(B, bb),)

    out = pl.pallas_call(
        twinned_q_kernel,
        out_shape=jax.ShapeDtypeStruct((B, 2), jnp.float32),
        grid=grid,
        in_specs=[
            pl.BlockSpec((bb, Zdim), lambda i: (i, 0)),    # z  (batch-tiled, bf16)
            pl.BlockSpec((bb, A),    lambda i: (i, 0)),    # action (batch-tiled, f32)
            pl.BlockSpec((Zdim, H1p), lambda i: (0, 0)),   # W1 z-part (bf16, resident)
            pl.BlockSpec((A, H1p),    lambda i: (0, 0)),   # W1 action-part (f32)
            pl.BlockSpec((1, H1p),    lambda i: (0, 0)),   # b1
            pl.BlockSpec((H1p, H2p),  lambda i: (0, 0)),   # W2 block-diagonal (bf16)
            pl.BlockSpec((1, H2p),    lambda i: (0, 0)),   # b2
            pl.BlockSpec((H2p, 2),    lambda i: (0, 0)),   # W3 block-diagonal (bf16)
            pl.BlockSpec((1, 2),      lambda i: (0, 0)),   # b3
        ],
        out_specs=pl.BlockSpec((bb, 2), lambda i: (i, 0)),
        compiler_params=pltpu.CompilerParams(
            # Batch rows are independent -> let v7x split them across its 2 TCs
            # (no-op on v5e/v6e which have a single TensorCore).
            dimension_semantics=("parallel",),
            # Lane-padded, double-buffered batch tiles can exceed v5e's 16 MiB
            # scoped-VMEM default at bb=4096; 32 MiB is safe on v5e/v6e/v7x.
            vmem_limit_bytes=32 * 1024 * 1024),
    )(z, action, w1z, w1a, b1p, w2p, b2p, w3p, b3p)

    return out


def twinned_q_forward(z, action, packed, *, block_b=4096):
    """Returns (q1, q2), each (B, 1), matching the PyTorch forward.

    NOTE: downstream SAC-style code should prefer twinned_q_packed() (or take
    jnp.min over axis 1 of its output) to avoid the two strided slices below.
    """
    out = twinned_q_packed(z, action, packed, block_b=block_b)
    return out[:, 0:1], out[:, 1:2]


def init_params(key, input_dim, hidden_units=(32, 32), output_dim=1):
    """Deterministic synthetic init (xavier-uniform-like) for both twin nets.

    Stored per-net as (2, in, out) / (2, out) so the reference can use them
    directly; `pack_params` converts to the fused kernel layout.
    """
    dims = (input_dim,) + tuple(hidden_units) + (output_dim,)
    keys = jax.random.split(key, 2 * (len(dims) - 1))
    ws, bs = [], []
    ki = 0
    for i in range(len(dims) - 1):
        fan_in, fan_out = dims[i], dims[i + 1]
        limit = jnp.sqrt(6.0 / (fan_in + fan_out))
        w = jax.random.uniform(keys[ki], (2, fan_in, fan_out),
                               minval=-limit, maxval=limit, dtype=jnp.float32)
        b = jax.random.uniform(keys[ki + 1], (2, fan_out),
                               minval=-0.01, maxval=0.01, dtype=jnp.float32)
        ws.append(w)
        bs.append(b)
        ki += 2
    w1, w2, w3 = ws
    b1, b2, b3 = bs
    return (w1, b1, w2, b2, w3, b3)


def reference_forward(z, action, params):
    """Pure-JAX f32 reference identical to the PyTorch module semantics."""
    x = jnp.concatenate([z, action], axis=1).astype(jnp.float32)
    w1, b1, w2, b2, w3, b3 = params
    outs = []
    for n in range(2):
        h = _leaky_relu(x @ w1[n] + b1[n])
        h = _leaky_relu(h @ w2[n] + b2[n])
        outs.append(h @ w3[n] + b3[n])
    return outs[0], outs[1]


if __name__ == "__main__":
    # Small shapes consistent with the module: action_dim=4, z1_dim=16, z2_dim=16
    batch = 2
    action_dim = 4
    z1_dim, z2_dim = 16, 16
    hidden_units = (32, 32)
    z_dim = z1_dim + z2_dim                 # 32
    input_dim = action_dim + z_dim          # 36

    key = jax.random.PRNGKey(0)
    kz, ka, kp = jax.random.split(key, 3)
    z = jax.random.normal(kz, (batch, z_dim), dtype=jnp.float32)
    action = jax.random.normal(ka, (batch, action_dim), dtype=jnp.float32)

    params = init_params(kp, input_dim, hidden_units=hidden_units, output_dim=1)
    packed = pack_params(params, z_dim)

    q1, q2 = twinned_q_forward(z, action, packed)
    jax.block_until_ready((q1, q2))

    r1, r2 = reference_forward(z, action, params)
    assert q1.shape == (batch, 1) and q2.shape == (batch, 1)
    # Tolerance loosened vs. the pure-f32 version: matmul operands are bf16
    # (f32 MXU accumulation keeps the error at the ~1e-2 level).
    assert jnp.allclose(q1, r1, atol=1e-1, rtol=1e-1)
    assert jnp.allclose(q2, r2, atol=1e-1, rtol=1e-1)

    print("KERNEL_OK")
</pallas_src>

<mosaic_0001>
module attributes {stable_mosaic.version = 11 : i64} {
  func.func @twinned_q_kernel(%arg0: i32, %arg1: memref<2x32xbf16, #tpu.memory_space<vmem>>, %arg2: memref<2x4xf32, #tpu.memory_space<vmem>>, %arg3: memref<32x64xbf16, #tpu.memory_space<vmem>>, %arg4: memref<4x64xf32, #tpu.memory_space<vmem>>, %arg5: memref<1x64xf32, #tpu.memory_space<vmem>>, %arg6: memref<64x64xbf16, #tpu.memory_space<vmem>>, %arg7: memref<1x64xf32, #tpu.memory_space<vmem>>, %arg8: memref<64x2xbf16, #tpu.memory_space<vmem>>, %arg9: memref<1x2xf32, #tpu.memory_space<vmem>>, %arg10: memref<2x2xf32, #tpu.memory_space<vmem>>) attributes {dimension_semantics = [#tpu.dimension_semantics<parallel>], iteration_bounds = array<i64: 1>, scalar_prefetch = 0 : i64, scratch_operands = 0 : i64, tpu.core_type = #tpu.core_type<tc>, window_params = [{transform_indices = @transform_0, window_bounds = array<i64: 2, 32>}, {transform_indices = @transform_1, window_bounds = array<i64: 2, 4>}, {pipeline_mode = #tpu.pipeline_mode<synchronous>, transform_indices = @transform_2, window_bounds = array<i64: 32, 64>}, {pipeline_mode = #tpu.pipeline_mode<synchronous>, transform_indices = @transform_3, window_bounds = array<i64: 4, 64>}, {pipeline_mode = #tpu.pipeline_mode<synchronous>, transform_indices = @transform_4, window_bounds = array<i64: 1, 64>}, {pipeline_mode = #tpu.pipeline_mode<synchronous>, transform_indices = @transform_5, window_bounds = array<i64: 64, 64>}, {pipeline_mode = #tpu.pipeline_mode<synchronous>, transform_indices = @transform_6, window_bounds = array<i64: 1, 64>}, {pipeline_mode = #tpu.pipeline_mode<synchronous>, transform_indices = @transform_7, window_bounds = array<i64: 64, 2>}, {pipeline_mode = #tpu.pipeline_mode<synchronous>, transform_indices = @transform_8, window_bounds = array<i64: 1, 2>}, {transform_indices = @transform_9, window_bounds = array<i64: 2, 2>}]} {
    %c0 = arith.constant 0 : index
    %c0_0 = arith.constant 0 : index
    %0 = vector.load %arg1[%c0, %c0_0] : memref<2x32xbf16, #tpu.memory_space<vmem>>, vector<2x32xbf16>
    %c0_1 = arith.constant 0 : index
    %c0_2 = arith.constant 0 : index
    %1 = vector.load %arg3[%c0_1, %c0_2] : memref<32x64xbf16, #tpu.memory_space<vmem>>, vector<32x64xbf16>
    %cst = arith.constant dense<0.000000e+00> : vector<2x64xf32>
    %2 = tpu.matmul %0, %1, %cst {dimension_numbers = #tpu.dot_dimension_numbers<[1], [0], [0], [1], [0, 0, 1, 1], [], []>} : vector<2x32xbf16>, vector<32x64xbf16>, vector<2x64xf32> -> vector<2x64xf32>
    %c0_3 = arith.constant 0 : index
    %c0_4 = arith.constant 0 : index
    %3 = vector.load %arg5[%c0_3, %c0_4] : memref<1x64xf32, #tpu.memory_space<vmem>>, vector<1x64xf32>
    %4 = vector.broadcast %3 : vector<1x64xf32> to vector<2x64xf32>
    %5 = arith.addf %2, %4 : vector<2x64xf32>
    %c0_5 = arith.constant 0 : index
    %c0_6 = arith.constant 0 : index
    %6 = vector.load %arg2[%c0_5, %c0_6] : memref<2x4xf32, #tpu.memory_space<vmem>>, vector<2x4xf32>
    %c0_7 = arith.constant 0 : index
    %c0_8 = arith.constant 0 : index
    %7 = vector.load %arg4[%c0_7, %c0_8] : memref<4x64xf32, #tpu.memory_space<vmem>>, vector<4x64xf32>
    %8 = vector.extract_strided_slice %6 {offsets = [0, 0], sizes = [2, 1], strides = [1, 1]} : vector<2x4xf32> to vector<2x1xf32>
    %9 = vector.extract_strided_slice %7 {offsets = [0, 0], sizes = [1, 64], strides = [1, 1]} : vector<4x64xf32> to vector<1x64xf32>
    %10 = vector.broadcast %8 : vector<2x1xf32> to vector<2x64xf32>
    %11 = vector.broadcast %9 : vector<1x64xf32> to vector<2x64xf32>
    %12 = arith.mulf %10, %11 : vector<2x64xf32>
    %13 = arith.addf %5, %12 : vector<2x64xf32>
    %14 = vector.extract_strided_slice %6 {offsets = [0, 1], sizes = [2, 1], strides = [1, 1]} : vector<2x4xf32> to vector<2x1xf32>
    %15 = vector.extract_strided_slice %7 {offsets = [1, 0], sizes = [1, 64], strides = [1, 1]} : vector<4x64xf32> to vector<1x64xf32>
    %16 = vector.broadcast %14 : vector<2x1xf32> to vector<2x64xf32>
    %17 = vector.broadcast %15 : vector<1x64xf32> to vector<2x64xf32>
    %18 = arith.mulf %16, %17 : vector<2x64xf32>
    %19 = arith.addf %13, %18 : vector<2x64xf32>
    %20 = vector.extract_strided_slice %6 {offsets = [0, 2], sizes = [2, 1], strides = [1, 1]} : vector<2x4xf32> to vector<2x1xf32>
    %21 = vector.extract_strided_slice %7 {offsets = [2, 0], sizes = [1, 64], strides = [1, 1]} : vector<4x64xf32> to vector<1x64xf32>
    %22 = vector.broadcast %20 : vector<2x1xf32> to vector<2x64xf32>
    %23 = vector.broadcast %21 : vector<1x64xf32> to vector<2x64xf32>
    %24 = arith.mulf %22, %23 : vector<2x64xf32>
    %25 = arith.addf %19, %24 : vector<2x64xf32>
    %26 = vector.extract_strided_slice %6 {offsets = [0, 3], sizes = [2, 1], strides = [1, 1]} : vector<2x4xf32> to vector<2x1xf32>
    %27 = vector.extract_strided_slice %7 {offsets = [3, 0], sizes = [1, 64], strides = [1, 1]} : vector<4x64xf32> to vector<1x64xf32>
    %28 = vector.broadcast %26 : vector<2x1xf32> to vector<2x64xf32>
    %29 = vector.broadcast %27 : vector<1x64xf32> to vector<2x64xf32>
    %30 = arith.mulf %28, %29 : vector<2x64xf32>
    %31 = arith.addf %25, %30 : vector<2x64xf32>
    %cst_9 = arith.constant 2.000000e-01 : f32
    %32 = vector.broadcast %cst_9 : f32 to vector<2x64xf32>
    %33 = arith.mulf %32, %31 : vector<2x64xf32>
    %34 = arith.maximumf %31, %33 : vector<2x64xf32>
    %35 = arith.truncf %34 : vector<2x64xf32> to vector<2x64xbf16>
    %c0_10 = arith.constant 0 : index
    %c0_11 = arith.constant 0 : index
    %36 = vector.load %arg6[%c0_10, %c0_11] : memref<64x64xbf16, #tpu.memory_space<vmem>>, vector<64x64xbf16>
    %cst_12 = arith.constant dense<0.000000e+00> : vector<2x64xf32>
    %37 = tpu.matmul %35, %36, %cst_12 {dimension_numbers = #tpu.dot_dimension_numbers<[1], [0], [0], [1], [0, 0, 1, 1], [], []>} : vector<2x64xbf16>, vector<64x64xbf16>, vector<2x64xf32> -> vector<2x64xf32>
    %c0_13 = arith.constant 0 : index
    %c0_14 = arith.constant 0 : index
    %38 = vector.load %arg7[%c0_13, %c0_14] : memref<1x64xf32, #tpu.memory_space<vmem>>, vector<1x64xf32>
    %39 = vector.broadcast %38 : vector<1x64xf32> to vector<2x64xf32>
    %40 = arith.addf %37, %39 : vector<2x64xf32>
    %cst_15 = arith.constant 2.000000e-01 : f32
    %41 = vector.broadcast %cst_15 : f32 to vector<2x64xf32>
    %42 = arith.mulf %41, %40 : vector<2x64xf32>
    %43 = arith.maximumf %40, %42 : vector<2x64xf32>
    %44 = arith.truncf %43 : vector<2x64xf32> to vector<2x64xbf16>
    %c0_16 = arith.constant 0 : index
    %c0_17 = arith.constant 0 : index
    %45 = vector.load %arg8[%c0_16, %c0_17] : memref<64x2xbf16, #tpu.memory_space<vmem>>, vector<64x2xbf16>
    %cst_18 = arith.constant dense<0.000000e+00> : vector<2x2xf32>
    %46 = tpu.matmul %44, %45, %cst_18 {dimension_numbers = #tpu.dot_dimension_numbers<[1], [0], [0], [1], [0, 0, 1, 1], [], []>} : vector<2x64xbf16>, vector<64x2xbf16>, vector<2x2xf32> -> vector<2x2xf32>
    %c0_19 = arith.constant 0 : index
    %c0_20 = arith.constant 0 : index
    %47 = vector.load %arg9[%c0_19, %c0_20] : memref<1x2xf32, #tpu.memory_space<vmem>>, vector<1x2xf32>
    %48 = vector.broadcast %47 : vector<1x2xf32> to vector<2x2xf32>
    %49 = arith.addf %46, %48 : vector<2x2xf32>
    %c0_21 = arith.constant 0 : index
    %c0_22 = arith.constant 0 : index
    %50 = vector.load %arg10[%c0_21, %c0_22] : memref<2x2xf32, #tpu.memory_space<vmem>>, vector<2x2xf32>
    tpu.vector_store %arg10[%c0_21, %c0_22], %49 {strides = array<i32>} : memref<2x2xf32, #tpu.memory_space<vmem>>, vector<2x2xf32>,
    return
  }
  func.func @transform_0(%arg0: i32) -> (i32, i32) {
    %c0_i32 = arith.constant 0 : i32
    %c0_i32_0 = arith.constant 0 : i32
    return %arg0, %c0_i32 : i32, i32
  }
  func.func @transform_1(%arg0: i32) -> (i32, i32) {
    %c0_i32 = arith.constant 0 : i32
    %c0_i32_0 = arith.constant 0 : i32
    return %arg0, %c0_i32 : i32, i32
  }
  func.func @transform_2(%arg0: i32) -> (i32, i32) {
    %c0_i32 = arith.constant 0 : i32
    %c0_i32_0 = arith.constant 0 : i32
    %c0_i32_1 = arith.constant 0 : i32
    return %c0_i32, %c0_i32_0 : i32, i32
  }
  func.func @transform_3(%arg0: i32) -> (i32, i32) {
    %c0_i32 = arith.constant 0 : i32
    %c0_i32_0 = arith.constant 0 : i32
    %c0_i32_1 = arith.constant 0 : i32
    return %c0_i32, %c0_i32_0 : i32, i32
  }
  func.func @transform_4(%arg0: i32) -> (i32, i32) {
    %c0_i32 = arith.constant 0 : i32
    %c0_i32_0 = arith.constant 0 : i32
    %c0_i32_1 = arith.constant 0 : i32
    return %c0_i32, %c0_i32_0 : i32, i32
  }
  func.func @transform_5(%arg0: i32) -> (i32, i32) {
    %c0_i32 = arith.constant 0 : i32
    %c0_i32_0 = arith.constant 0 : i32
    %c0_i32_1 = arith.constant 0 : i32
    return %c0_i32, %c0_i32_0 : i32, i32
  }
  func.func @transform_6(%arg0: i32) -> (i32, i32) {
    %c0_i32 = arith.constant 0 : i32
    %c0_i32_0 = arith.constant 0 : i32
    %c0_i32_1 = arith.constant 0 : i32
    return %c0_i32, %c0_i32_0 : i32, i32
  }
  func.func @transform_7(%arg0: i32) -> (i32, i32) {
    %c0_i32 = arith.constant 0 : i32
    %c0_i32_0 = arith.constant 0 : i32
    %c0_i32_1 = arith.constant 0 : i32
    return %c0_i32, %c0_i32_0 : i32, i32
  }
  func.func @transform_8(%arg0: i32) -> (i32, i32) {
    %c0_i32 = arith.constant 0 : i32
    %c0_i32_0 = arith.constant 0 : i32
    %c0_i32_1 = arith.constant 0 : i32
    return %c0_i32, %c0_i32_0 : i32, i32
  }
  func.func @transform_9(%arg0: i32) -> (i32, i32) {
    %c0_i32 = arith.constant 0 : i32
    %c0_i32_0 = arith.constant 0 : i32
    return %arg0, %c0_i32 : i32, i32
  }
}

</mosaic_0001>

<bundles_post_ra>
// kernel: tpu_custom_call.1
= control target key start
LH: loop header
LB: loop body
LE: loop exit
PB: predicated region body
PF: predicated region fallthrough
CT: control target
= control target key end

     0   :  { %14 = vsyncpa [#allocation3], 0  ;;  %s670_s0 = inlined_call_operand.vmem [shape: bf16[2,32], index: 0, kind: input, shape index: {}]   ;;  %s671_s1 = inlined_call_operand.vmem [shape: f32[2,4], index: 1, kind: input, shape index: {}]   ;;  %s672_s2 = inlined_call_operand.vmem [shape: bf16[32,64], index: 2, kind: input, shape index: {}]   ;;  %s673_s3 = inlined_call_operand.hbm [shape: f32[4,64], index: 3, kind: input, shape index: {}]   ;;  %s674_s4 = inlined_call_operand.hbm [shape: f32[1,64], index: 4, kind: input, shape index: {}]   ;;  %s675_s5 = inlined_call_operand.vmem [shape: bf16[64,64], index: 5, kind: input, shape index: {}]   ;;  %s676_s6 = inlined_call_operand.vmem [shape: f32[1,64], index: 6, kind: input, shape index: {}]   ;;  %s677_s7 = inlined_call_operand.vmem [shape: bf16[64,2], index: 7, kind: input, shape index: {}]   ;;  %s678_s8 = inlined_call_operand.vmem [shape: f32[1,2], index: 8, kind: input, shape index: {}]   ;;  %s679_s9 = inlined_call_operand.hbm [shape: f32[2,2], index: 9, kind: output, shape index: {}]  }
   0x1   :  { %15 = vsyncpa [#allocation6], 0 }
   0x2   :  { %16 = vsyncpa [#allocation4], 0  ;;  %s515_s30 = smov [#allocation2]   ;;  %s516_s11 = smov [#allocation5]  }
   0x3   :  { %s29_s10 = sshll.u32 %s515_s30, 4  ;;  %s39_s12 = sshll.u32 %s516_s11, 4  ;;  %s30_s10 = int_to_ptr.vmem [resolvable:$true] %s29_s10  ;;  %s40_s12 = int_to_ptr.vmem [resolvable:$true] %s39_s12 }
   0x4   :  { %s443_s15 = scalar_lea.hbm %s673_s3, 64 }
   0x5   :  { %p444_p0 = scmp.ne.s32.totalorder %s673_s3, %s443_s15  ;;  %p447_p1 = scmp.lt.u32.totalorder %s443_s15, %s673_s3 }
   0x7   :  { %p449_p2 = pnand %p447_p1, %p444_p0 }
   0x9   :  { %452 = shalt.err (!%p449_p2)
}
   0xa   :  { %s453_s20 = scalar_lea.vmem %s30_s10, 64  ;;  %p458_p4 = scmp.lt.s32.totalorder %s30_s10, %s30_s10 }
   0xb   :  { %p454_p3 = scmp.ne.s32.totalorder %s30_s10, %s453_s20  ;;  %p459_p5 = scmp.lt.s32.totalorder %s453_s20, %s453_s20 }
   0xd   :  { %p460_p6 = por %p459_p5, %p458_p4 }
   0xf   :  { %p461_p7 = pnand %p460_p6, %p454_p3 }
  0x11   :  { %464 = shalt.err (!%p461_p7)
}
  0x12   :  { %32 = dma.hbm_to_vmem [thread:$0]  %s673_s3, 64, %s30_s10, [#allocation3]  }
  0x13   :  { %s465_s25 = scalar_lea.hbm %s674_s4, 16 }
  0x14   :  { %p466_p8 = scmp.ne.s32.totalorder %s674_s4, %s465_s25  ;;  %p469_p9 = scmp.lt.u32.totalorder %s465_s25, %s674_s4 }
  0x16   :  { %p471_p10 = pnand %p469_p9, %p466_p8 }
  0x18   :  { %474 = shalt.err (!%p471_p10)
}
  0x19   :  { %s475_s30 = scalar_lea.vmem %s40_s12, 16  ;;  %s479_s11 = scalar_lea.vmem %s40_s12, 32 }
  0x1a   :  { %p476_p11 = scmp.ne.s32.totalorder %s40_s12, %s475_s30  ;;  %p480_p12 = scmp.lt.s32.totalorder %s40_s12, %s40_s12 }
  0x1b   :  { %p481_p13 = scmp.lt.s32.totalorder %s479_s11, %s475_s30 }
  0x1d   :  { %p482_p0 = por %p481_p13, %p480_p12 }
  0x1f   :  { %p483_p1 = pnand %p482_p0, %p476_p11 }
  0x21   :  { %486 = shalt.err (!%p483_p1)
}
  0x22   :  { %42 = dma.hbm_to_vmem [thread:$0]  %s674_s4, 16, %s40_s12, [#allocation6]  }
  0x23   :  { %509 = dma.done.wait [#allocation3], 64  }
  0x24   :  { %510 = vsyncadd [#allocation3], 4294967232 }
  0x25   :  { %511 = dma.done.wait [#allocation6], 16  }
  0x26   :  { %512 = vsyncadd [#allocation6], 4294967280  ;;  %v517_v0 = vmov 0.0   ;;  %vm518_vm0 = vmmov 0   ;;  %v519_v1 = vmov 0   ;;  %v520_v2 = vmov 2  }
  0x27   :  { %387 = vmatprep.subr.bf16.mxu0 %v517_v0  ;;  %391 = vmatprep.mubr.msk.bf16.mxu0 %vm518_vm0, %v517_v0  ;;  %v433_v3 = vld [vmem:[%s672_s2] sm:$0xff]   ;;  %v434_v4 = vld [vmem:[%s672_s2 + $0x8] sm:$0xff]   ;;  %vm82_vm1 = vcmask 261120   ;;  %v521_v7 = vmov 1   ;;  %v522_v8 = vmov 3   ;;  %v437_v11 = vld [vmem:[%s675_s5 + $0x10] sm:$0xff]   ;;  %v133_v15 = vlaneseq }
  0x28   :  { %428 = vset.pattern.permute.xlu0 %v519_v1  ;;  %430 = vset.pattern.permute.xlu1 %v520_v2  ;;  %v126_v5 = vld [vmem:[%s671_s1] sm:$0x3]  ;;  %v436_v10 = vld [vmem:[%s675_s5 + $0x8] sm:$0xff]   ;;  %v438_v12 = vld [vmem:[%s675_s5 + $0x18] sm:$0xff]   ;;  %vm211_vm2 = vcmask 523264   ;;  %vm340_vm3 = vcmask 9216  }
  0x29   :  { %395 = vmatprep.subr.bf16.mxu1 %v517_v0  ;;  %403 = vmatprep.mubr.msk.bf16.mxu1 %vm518_vm0, %v517_v0  ;;  %v58_v6 = vld [vmem:[%s670_s0] sm:$0x1]  ;;  %v440_v14 = vld [vmem:[%s677_s7 + $0x8] sm:$0xff]   ;;  %v134_v16 = vshrl.u32 %v133_v15, 7  ;;  %v358_v26 = vld [vmem:[#allocation5] ss:$0 sm:$0xff] }
  0x2a   :  { %388 = vmatpush3.bf16.msra.mxu0 %v433_v3  ;;  %130 = vperm.xlu0 %428, %v126_v5   ;;  %v435_v9 = vld [vmem:[%s675_s5] sm:$0xff]   ;;  %v441_v47 = vld [vmem:[%s677_s7 + $0x10] sm:$0xff]   ;;  %v442_v48 = vld [vmem:[%s677_s7 + $0x18] sm:$0xff]  }
  0x2b   :  { %389 = vmatprep.subr.bf16.mxu0 %v517_v0  ;;  %150 = vperm.xlu1 %430, %v126_v5   ;;  %v439_v13 = vld [vmem:[%s677_s7] sm:$0xff]   ;;  %v135_v18 = vsub.s32 0, %v134_v16  ;;  %v145_v19 = vsub.s32 1, %v134_v16  ;;  %v155_v21 = vsub.s32 2, %v134_v16  ;;  %v165_v25 = vsub.s32 3, %v134_v16  ;;  %s523_s7 = smov [#allocation7]  }
  0x2c   :  { %396 = vmatpush3.bf16.msra.mxu1 %v435_v9  ;;  %v127_v20 = vld [vmem:[#allocation2] sm:$0xf]  ;;  %s348_s12 = sshll.u32 %s523_s7, 4  ;;  %s349_s12 = int_to_ptr.vmem [resolvable:$true] %s348_s12 }
  0x2d   :  { %397 = vmatprep.subr.bf16.mxu1 %v517_v0  ;;  %v136_v23 = vrot.slane %v127_v20, %v135_v18  ;;  %v146_v24 = vrot.slane %v127_v20, %v145_v19  ;;  %v156_v29 = vrot.slane %v127_v20, %v155_v21  ;;  %v166_v34 = vrot.slane %v127_v20, %v165_v25  ;;  %v362_v49 = vld [vmem:[%s676_s6] ss:$0 sm:$0xff]  ;;  %s487_s6 = scalar_lea.vmem %s349_s12, 32  ;;  %p492_p3 = scmp.lt.s32.totalorder %s349_s12, %s349_s12 }
  0x2e   :  { %390 = vmatpush3.bf16.msra.mxu0 %v434_v4  ;;  %429 = vset.pattern.permute.xlu0 %v521_v7  ;;  %v368_v58 = vld [vmem:[%s678_s8] ss:$0 sm:$0xff]  ;;  %p488_p2 = scmp.ne.s32.totalorder %s349_s12, %s487_s6  ;;  %p493_p4 = scmp.lt.s32.totalorder %s487_s6, %s487_s6 }
  0x2f   :  { %407 = vmatprep.subr.bf16.mxu0 %v517_v0  ;;  %140 = vperm.xlu0 %429, %v126_v5  }
  0x30   :  { %431 = vset.pattern.permute.xlu1 %v522_v8  ;;  %398 = vmatpush3.bf16.msra.mxu1 %v436_v10  ;;  %p494_p5 = por %p493_p4, %p492_p3 }
  0x31   :  { %392 = vmatmul.mubr.msk.bf16.vlgmr.msra.gmra.mrb[0].mxu0 %vm82_vm1, %v58_v6  ;;  %160 = vperm.xlu1 %431, %v126_v5  }
  0x32   :  { %415 = vmatprep.mubr.msk.bf16.mxu0 %vm518_vm0, %v517_v0  ;;  %399 = vmatprep.subr.bf16.mxu1 %v517_v0  ;;  %p495_p6 = pnand %p494_p5, %p488_p2 }
  0x33   :  { %432 = vset.pattern.permute.xlu0 %v522_v8  ;;  %408 = vmatpush3.bf16.msra.mxu0 %v439_v13 }
  0x34   :  { %400 = vmatpush3.bf16.msra.mxu1 %v437_v11  ;;  %409 = vmatprep.subr.bf16.mxu0 %v517_v0 }
  0x35   :  { %401 = vmatprep.subr.bf16.mxu1 %v517_v0 }
  0x37   :  { %410 = vmatpush3.bf16.msra.mxu0 %v440_v14 }
  0x38   :  { %402 = vmatpush3.bf16.msra.mxu1 %v438_v12  ;;  %411 = vmatprep.subr.bf16.mxu0 %v517_v0 }
  0x3b   :  { %412 = vmatpush3.bf16.msra.mxu0 %v441_v47 }
  0x3c   :  { %413 = vmatprep.subr.bf16.mxu0 %v517_v0 }
  0x3f   :  { %414 = vmatpush3.bf16.msra.mxu0 %v442_v48 }
  0xa9   :  { %v131_v17 = vpop.permute.xlu0 %130 }
  0xaa   :  { %v151_v22 = vpop.permute.xlu1 %150  ;;  %v137_v30 = vmul.f32 %v136_v23, %v131_v17 }
  0xab   :  { %v157_v39 = vmul.f32 %v156_v29, %v151_v22 }
  0xae   :  { %v141_v27 = vpop.permute.xlu0 %140 }
  0xaf   :  { %v147_v33 = vmul.f32 %v146_v24, %v141_v27 }
  0xb0   :  { %v161_v36 = vpop.permute.xlu1 %160 }
  0xb1   :  { %v167_v41 = vmul.f32 %v166_v34, %v161_v36 }
 0x104   :  { %v120_v28 = vpop.f32.mrb[0].mxu0 }
 0x105   :  { %v121_v31 = vadd.f32 %v358_v26, %v120_v28  ;;  %v393_v32 = vpop.f32.mrb[1].mxu0 }
 0x106   :  { %v123_v35 = vpop.f32.mrb[2].mxu0 }
 0x107   :  { %v138_v37 = vadd.f32 %v137_v30, %v121_v31  ;;  %v394_v38 = vpop.f32.mrb[3].mxu0 }
 0x109   :  { %v148_v40 = vadd.f32 %v147_v33, %v138_v37 }
 0x10b   :  { %v158_v42 = vadd.f32 %v157_v39, %v148_v40 }
 0x10d   :  { %v168_v43 = vadd.f32 %v167_v41, %v158_v42 }
 0x10f   :  { %v169_v44 = vmul.f32 0.2, %v168_v43 }
 0x111   :  { %v170_v45 = vmax.f32 %v168_v43, %v169_v44 }
 0x113   :  { %v171_v46 = vpack.c.bf16 %v170_v45, %v170_v45 }
 0x115   :  { %404 = vmatmul.mubr.msk.bf16.vlgmr.msra.gmra.mrb[0].mxu1 %vm211_vm2, %v171_v46 }
 0x1e8   :  { %v249_v50 = vpop.f32.mrb[0].mxu1 }
 0x1e9   :  { %v250_v51 = vadd.f32 %v362_v49, %v249_v50  ;;  %v405_v52 = vpop.f32.mrb[1].mxu1 }
 0x1ea   :  { %v252_v53 = vpop.f32.mrb[2].mxu1 }
 0x1eb   :  { %v255_v54 = vmul.f32 0.2, %v250_v51  ;;  %v406_v55 = vpop.f32.mrb[3].mxu1 }
 0x1ed   :  { %v256_v56 = vmax.f32 %v250_v51, %v255_v54 }
 0x1ef   :  { %v257_v57 = vpack.c.bf16 %v256_v56, %v256_v56 }
 0x1f1   :  { %416 = vmatmul.mubr.msk.bf16.vlgmr.msra.gmra.mrb[4].mxu0 %vm211_vm2, %v257_v57 }
 0x2c4   :  { %v334_v59 = vpop.f32.mrb[4].mxu0 }
 0x2c5   :  { %v335_v60 = vadd.f32 %v368_v58, %v334_v59  ;;  %v417_v61 = vpop.f32.mrb[5].mxu0 }
 0x2c6   :  { %v337_v62 = vpop.f32.mrb[6].mxu0 }
 0x2c7   :  { %v418_v63 = vpop.f32.mrb[7].mxu0  ;;  %341 = vst.msk [vmem:[#allocation7] sm:$0x3] %vm340_vm3, %v335_v60 }
 0x2c8   :  { %498 = shalt.err (!%p495_p6)
}
 0x2c9   :  { %s499_s8 = scalar_lea.hbm %s679_s9, 32 }
 0x2ca   :  { %p500_p7 = scmp.ne.s32.totalorder %s679_s9, %s499_s8  ;;  %p503_p8 = scmp.lt.u32.totalorder %s499_s8, %s679_s9 }
 0x2cc   :  { %p505_p9 = pnand %p503_p8, %p500_p7 }
 0x2ce   :  { %508 = shalt.err (!%p505_p9)
}
 0x2cf   :  { %351 = dma.vmem_to_hbm [thread:$0]  %s349_s12, 32, %s679_s9, [#allocation4]  }
 0x2d0   :  { %513 = dma.done.wait [#allocation4], 32  }
 0x2d1   :  { %514 = vsyncadd [#allocation4], 4294967264 }
 0x2d2   :  { %355 = vsyncpa [#allocation3], 1 }
 0x2d3   :  { %356 = vsyncpa [#allocation6], 1 }
 0x2d4   :  { %357 = vsyncpa [#allocation4], 1 }

</bundles_post_ra>
